<compile_context>
chip_gen: v7x
topology: tpu7x:2x2x1
jax: 0.10.0
libtpu: 0.0.40
codegen_flags: <defaults>
</compile_context>

<pallas_src>
import jax
import jax.numpy as jnp
from jax.experimental import pallas as pl
from jax.experimental.pallas import tpu as pltpu


# --------------------------------------------------------------------------- #
# Kernels
# --------------------------------------------------------------------------- #
def _linear_kernel_1k(x_ref, w_ref, b_ref, o_ref):
    """Single K-tile: no accumulator scratch, fused dot + bias + store."""
    o_ref[...] = (
        jnp.dot(x_ref[...], w_ref[...], preferred_element_type=jnp.float32)
        + b_ref[...]
    ).astype(o_ref.dtype)


def _linear_kernel_nk(x_ref, w_ref, b_ref, o_ref, acc_ref):
    """Multi K-tile: f32 VMEM accumulator, final K-step folded into the store."""
    k = pl.program_id(2)
    nk = pl.num_programs(2)
    part = jnp.dot(x_ref[...], w_ref[...], preferred_element_type=jnp.float32)

    @pl.when(k == 0)
    def _init():
        acc_ref[...] = part

    @pl.when(jnp.logical_and(k > 0, k < nk - 1))
    def _accum():
        acc_ref[...] = acc_ref[...] + part

    @pl.when(k == nk - 1)
    def _finalize():
        # acc holds the sum of all previous K steps; add this step's partial
        # and the bias, cast, store (no extra acc write+read round trip).
        o_ref[...] = (acc_ref[...] + part + b_ref[...]).astype(o_ref.dtype)


# --------------------------------------------------------------------------- #
# Helpers
# --------------------------------------------------------------------------- #
def _round_up(v, m):
    return ((v + m - 1) // m) * m


def _largest_divisor_tile(total, max_tile, quantum):
    """Largest multiple of `quantum` that divides `total` and is <= max_tile.

    Assumes `total % quantum == 0` (so at worst returns `quantum`).
    """
    if total <= max_tile:
        return total
    t = (max_tile // quantum) * quantum
    while t >= quantum:
        if total % t == 0:
            return t
        t -= quantum
    return quantum


def _device_info():
    """Generation-gated tiling / VMEM budget (v5e/v6e: 128 MiB, v7x: 64 MiB)."""
    kind = ""
    try:
        kind = jax.devices()[0].device_kind.lower()
    except Exception:  # pragma: no cover - defensive only
        pass
    if "v7" in kind:
        return dict(
            max_tb=512, max_tn=512, max_tk=1024,
            vmem_limit=48 * 1024 * 1024, two_cores=True,
        )
    # v5e / v6e / unknown: 128 MiB VMEM -> push tiles larger.
    return dict(
        max_tb=1024, max_tn=1024, max_tk=2048,
        vmem_limit=96 * 1024 * 1024, two_cores=False,
    )


# --------------------------------------------------------------------------- #
# One-time parameter preparation (do NOT call per forward step)
# --------------------------------------------------------------------------- #
def prepare_linear_params(weight, bias, param_dtype=None):
    """Transpose (N, K) -> (K, N) and pad N to a 128-lane multiple, once.

    Returns (w_kn, bias_row, n_out) to be reused across forward calls.
    `param_dtype` (e.g. jnp.bfloat16) optionally stores W in a narrower dtype
    for the memory-bound regime; bias stays float32 for the f32 accumulator.
    """
    N, K = weight.shape
    assert bias.shape == (N,)
    N_pad = _round_up(N, 128)

    w_kn = weight.T  # (K, N)
    b = bias
    if N_pad != N:
        w_kn = jnp.pad(w_kn, ((0, 0), (0, N_pad - N)))
        b = jnp.pad(bias, (0, N_pad - N))
    if param_dtype is not None:
        w_kn = w_kn.astype(param_dtype)
    bias_row = b.reshape(1, N_pad).astype(jnp.float32)
    return w_kn, bias_row, N


# --------------------------------------------------------------------------- #
# Forward
# --------------------------------------------------------------------------- #
def linear_forward(x, w_kn, bias_row, n_out, *, tile_b=None, tile_n=None,
                   tile_k=None):
    """y = x @ w_kn + bias  with w_kn already (K, N_pad) and bias (1, N_pad)."""
    B, K = x.shape
    K_w, N_pad = w_kn.shape
    assert K == K_w, "input_dim mismatch"
    assert bias_row.shape == (1, N_pad)
    out_dtype = x.dtype
    info = _device_info()

    # ---------------- tile selection ----------------------------------------
    max_tb, max_tn, max_tk = info["max_tb"], info["max_tn"], info["max_tk"]

    # N: always a multiple of 128 (N_pad is); lane-dense output stores.
    tn = tile_n if tile_n is not None else _largest_divisor_tile(N_pad, max_tn, 128)

    # K: prefer a single full-K block (no HBM pad of x); tile only if large.
    if tile_k is not None:
        tk = tile_k
        K_pad = _round_up(K, tk)
    elif K <= max_tk:
        tk, K_pad = K, K                      # full-dim block, no padding
    elif K % 128 == 0:
        tk = _largest_divisor_tile(K, max_tk, 128)
        K_pad = K
    else:
        tk = max_tk                           # rare fallback: pad K
        K_pad = _round_up(K, tk)

    # B: prefer a single full-B block; otherwise 256-aligned tiles when possible.
    if tile_b is not None:
        tb = tile_b
        B_pad = _round_up(B, tb)
    elif B <= max_tb:
        tb, B_pad = B, B                      # full-dim block, no padding
    elif B % 256 == 0:
        tb = _largest_divisor_tile(B, max_tb, 256)
        B_pad = B
    elif B % 8 == 0:
        tb = _largest_divisor_tile(B, max_tb, 8)
        B_pad = B
    else:
        tb = max_tb
        B_pad = _round_up(B, tb)

    nbt, nnt, nkt = B_pad // tb, N_pad // tn, K_pad // tk

    # v7x: make sure there are >=2 parallel tiles so both TensorCores get work
    # (only for non-trivial problem sizes, and only if not user-overridden).
    if (info["two_cores"] and tile_b is None and tile_n is None
            and nbt * nnt == 1 and B_pad * K_pad * N_pad >= (1 << 21)):
        if B_pad >= 512 and B_pad % 16 == 0:
            tb = B_pad // 2
        elif N_pad >= 256 and (N_pad // 2) % 128 == 0:
            tn = N_pad // 2
        nbt, nnt = B_pad // tb, N_pad // tn

    # ---------------- (rare) input padding -----------------------------------
    x_p = x
    if (B_pad, K_pad) != (B, K):
        x_p = jnp.pad(x, ((0, B_pad - B), (0, K_pad - K)))
    w_p = w_kn
    if K_pad != K:
        # Fallback only (K > max_tk and K % 128 != 0). Pre-pad K in
        # prepare_linear_params if this path is ever hot.
        w_p = jnp.pad(w_kn, ((0, K_pad - K), (0, 0)))

    # ---------------- specs / kernel choice ----------------------------------
    if nkt == 1:
        kernel = _linear_kernel_1k
        grid = (nbt, nnt)
        in_specs = [
            pl.BlockSpec((tb, tk), lambda i, j: (i, 0)),   # x tile
            pl.BlockSpec((tk, tn), lambda i, j: (0, j)),   # W^T tile
            pl.BlockSpec((1, tn), lambda i, j: (0, j)),    # bias tile
        ]
        out_spec = pl.BlockSpec((tb, tn), lambda i, j: (i, j))
        scratch = []
        dims = ("parallel", "parallel")
    else:
        kernel = _linear_kernel_nk
        grid = (nbt, nnt, nkt)
        in_specs = [
            pl.BlockSpec((tb, tk), lambda i, j, k: (i, k)),
            pl.BlockSpec((tk, tn), lambda i, j, k: (k, j)),
            pl.BlockSpec((1, tn), lambda i, j, k: (0, j)),
        ]
        out_spec = pl.BlockSpec((tb, tn), lambda i, j, k: (i, j))
        scratch = [pltpu.VMEM((tb, tn), jnp.float32)]
        dims = ("parallel", "parallel", "arbitrary")

    # ---------------- cost estimate (accounts for re-streaming) --------------
    x_bytes = jnp.dtype(x.dtype).itemsize
    w_bytes = jnp.dtype(w_p.dtype).itemsize
    o_bytes = jnp.dtype(out_dtype).itemsize
    flops = 2 * B_pad * K_pad * N_pad
    bytes_accessed = (
        B_pad * K_pad * x_bytes * nnt      # x re-streamed once per N tile
        + K_pad * N_pad * w_bytes * nbt    # W re-streamed once per batch tile
        + N_pad * 4 * nbt                  # bias
        + B_pad * N_pad * o_bytes          # output writeback
    )

    out_padded = pl.pallas_call(
        kernel,
        out_shape=jax.ShapeDtypeStruct((B_pad, N_pad), out_dtype),
        grid_spec=pltpu.PrefetchScalarGridSpec(
            num_scalar_prefetch=0,
            grid=grid,
            in_specs=in_specs,
            out_specs=out_spec,
            scratch_shapes=scratch,
        ),
        compiler_params=pltpu.CompilerParams(
            dimension_semantics=dims,
            vmem_limit_bytes=info["vmem_limit"],
        ),
        cost_estimate=pl.CostEstimate(
            flops=flops, transcendentals=0, bytes_accessed=bytes_accessed
        ),
    )(x_p, w_p, bias_row)

    if (B_pad, N_pad) != (B, n_out):
        return out_padded[:B, :n_out]
    return out_padded


def logistic_regression_forward(x, weight, bias, **tile_kwargs):
    """Convenience one-shot wrapper (prefer prepare_linear_params + linear_forward
    when calling repeatedly with the same parameters)."""
    w_kn, bias_row, n_out = prepare_linear_params(weight, bias)
    return linear_forward(x, w_kn, bias_row, n_out, **tile_kwargs)


# --------------------------------------------------------------------------- #
# Self-test
# --------------------------------------------------------------------------- #
if __name__ == "__main__":
    key = jax.random.PRNGKey(0)

    # --- 1) Small shapes consistent with LogisticRegression(input_dim, output_dim).
    batch, input_dim, output_dim = 8, 32, 16
    kx, kw, kb = jax.random.split(key, 3)
    bound = 1.0 / (input_dim ** 0.5)
    x = jax.random.normal(kx, (batch, input_dim), dtype=jnp.float32)
    weight = jax.random.uniform(
        kw, (output_dim, input_dim), minval=-bound, maxval=bound,
        dtype=jnp.float32)
    bias = jax.random.uniform(
        kb, (output_dim,), minval=-bound, maxval=bound, dtype=jnp.float32)

    w_kn, b_row, n_out = prepare_linear_params(weight, bias)   # once
    y = linear_forward(x, w_kn, b_row, n_out)                  # per step
    y = jax.block_until_ready(y)
    y_ref = x @ weight.T + bias
    assert y.shape == (batch, output_dim)
    assert jnp.allclose(y, y_ref, atol=1e-5, rtol=1e-5)

    # --- 2) Ragged shapes: full-dim (unpadded) B/K blocks, N padded to 256.
    B2, K2, N2 = 200, 200, 130
    kx2, kw2, kb2 = jax.random.split(jax.random.PRNGKey(1), 3)
    x2 = jax.random.normal(kx2, (B2, K2), dtype=jnp.float32)
    w2 = jax.random.normal(kw2, (N2, K2), dtype=jnp.float32) * 0.05
    b2 = jax.random.normal(kb2, (N2,), dtype=jnp.float32)

    y2 = jax.block_until_ready(logistic_regression_forward(x2, w2, b2))
    y2_ref = x2 @ w2.T + b2
    assert y2.shape == (B2, N2)
    assert jnp.allclose(y2, y2_ref, atol=1e-4, rtol=1e-4)

    # --- 3) Multi-K-tile path (forced small tiles) to exercise the accumulator
    #        kernel with the fold-last-step finalize.
    B3, K3, N3 = 256, 512, 384
    kx3, kw3, kb3 = jax.random.split(jax.random.PRNGKey(2), 3)
    x3 = jax.random.normal(kx3, (B3, K3), dtype=jnp.float32)
    w3 = jax.random.normal(kw3, (N3, K3), dtype=jnp.float32) * 0.02
    b3 = jax.random.normal(kb3, (N3,), dtype=jnp.float32)

    y3 = logistic_regression_forward(
        x3, w3, b3, tile_b=128, tile_n=128, tile_k=128)
    y3 = jax.block_until_ready(y3)
    y3_ref = x3 @ w3.T + b3
    assert y3.shape == (B3, N3)
    assert jnp.allclose(y3, y3_ref, atol=1e-4, rtol=1e-4)

    print("KERNEL_OK")
</pallas_src>

<mosaic_0001>
module attributes {stable_mosaic.version = 11 : i64} {
  func.func @_linear_kernel_1k(%arg0: i32, %arg1: i32, %arg2: memref<8x32xf32, #tpu.memory_space<vmem>>, %arg3: memref<32x128xf32, #tpu.memory_space<vmem>>, %arg4: memref<1x128xf32, #tpu.memory_space<vmem>>, %arg5: memref<8x128xf32, #tpu.memory_space<vmem>>) attributes {dimension_semantics = [#tpu.dimension_semantics<parallel>, #tpu.dimension_semantics<parallel>], iteration_bounds = array<i64: 1, 1>, scalar_prefetch = 0 : i64, scratch_operands = 0 : i64, tpu.core_type = #tpu.core_type<tc>, window_params = [{transform_indices = @transform_0, window_bounds = array<i64: 8, 32>}, {transform_indices = @transform_1, window_bounds = array<i64: 32, 128>}, {transform_indices = @transform_2, window_bounds = array<i64: 1, 128>}, {transform_indices = @transform_3, window_bounds = array<i64: 8, 128>}]} {
    %c0 = arith.constant 0 : index
    %c0_0 = arith.constant 0 : index
    %0 = vector.load %arg2[%c0, %c0_0] : memref<8x32xf32, #tpu.memory_space<vmem>>, vector<8x32xf32>
    %c0_1 = arith.constant 0 : index
    %c0_2 = arith.constant 0 : index
    %1 = vector.load %arg3[%c0_1, %c0_2] : memref<32x128xf32, #tpu.memory_space<vmem>>, vector<32x128xf32>
    %cst = arith.constant dense<0.000000e+00> : vector<8x128xf32>
    %2 = tpu.matmul %0, %1, %cst {dimension_numbers = #tpu.dot_dimension_numbers<[1], [0], [0], [1], [0, 0, 1, 1], [], []>} : vector<8x32xf32>, vector<32x128xf32>, vector<8x128xf32> -> vector<8x128xf32>
    %c0_3 = arith.constant 0 : index
    %c0_4 = arith.constant 0 : index
    %3 = vector.load %arg4[%c0_3, %c0_4] : memref<1x128xf32, #tpu.memory_space<vmem>>, vector<1x128xf32>
    %4 = vector.broadcast %3 : vector<1x128xf32> to vector<8x128xf32>
    %5 = arith.addf %2, %4 : vector<8x128xf32>
    %c0_5 = arith.constant 0 : index
    %c0_6 = arith.constant 0 : index
    %6 = vector.load %arg5[%c0_5, %c0_6] : memref<8x128xf32, #tpu.memory_space<vmem>>, vector<8x128xf32>
    tpu.vector_store %arg5[%c0_5, %c0_6], %5 {strides = array<i32>} : memref<8x128xf32, #tpu.memory_space<vmem>>, vector<8x128xf32>,
    return
  }
  func.func @transform_0(%arg0: i32, %arg1: i32) -> (i32, i32) {
    %c0_i32 = arith.constant 0 : i32
    %c0_i32_0 = arith.constant 0 : i32
    return %arg0, %c0_i32 : i32, i32
  }
  func.func @transform_1(%arg0: i32, %arg1: i32) -> (i32, i32) {
    %c0_i32 = arith.constant 0 : i32
    %c0_i32_0 = arith.constant 0 : i32
    return %c0_i32, %arg1 : i32, i32
  }
  func.func @transform_2(%arg0: i32, %arg1: i32) -> (i32, i32) {
    %c0_i32 = arith.constant 0 : i32
    %c0_i32_0 = arith.constant 0 : i32
    return %c0_i32, %arg1 : i32, i32
  }
  func.func @transform_3(%arg0: i32, %arg1: i32) -> (i32, i32) {
    %c0_i32 = arith.constant 0 : i32
    return %arg0, %arg1 : i32, i32
  }
}

</mosaic_0001>

<bundles_post_ra>
// kernel: tpu_custom_call.1
= control target key start
LH: loop header
LB: loop body
LE: loop exit
PB: predicated region body
PF: predicated region fallthrough
CT: control target
= control target key end

     0   :  { %8 = vsyncpa [#allocation3], 0  ;;  %s359_s0 = inlined_call_operand.hbm [shape: f32[8,32], index: 0, kind: input, shape index: {}]   ;;  %s360_s1 = inlined_call_operand.hbm [shape: f32[32,128], index: 1, kind: input, shape index: {}]   ;;  %s361_s2 = inlined_call_operand.hbm [shape: f32[1,128], index: 2, kind: input, shape index: {}]   ;;  %s362_s3 = inlined_call_operand.hbm [shape: f32[8,128], index: 3, kind: output, shape index: {}]  }
   0x1   :  { %9 = vsyncpa [#allocation6], 0 }
   0x2   :  { %10 = vsyncpa [#allocation4], 0  ;;  %s282_s12 = smov [#allocation5]   ;;  %s188_s16 = scalar_lea.hbm %s360_s1, 512 }
   0x3   :  { %s26_s13 = sshll.u32 %s282_s12, 4  ;;  %p189_p0 = scmp.ne.s32.totalorder %s360_s1, %s188_s16  ;;  %s27_s13 = int_to_ptr.vmem [resolvable:$true] %s26_s13 }
   0x4   :  { %p192_p1 = scmp.lt.u32.totalorder %s188_s16, %s360_s1 }
   0x6   :  { %p194_p2 = pnand %p192_p1, %p189_p0 }
   0x8   :  { %197 = shalt.err (!%p194_p2)
}
   0x9   :  { %s198_s21 = scalar_lea.vmem %s27_s13, 512  ;;  %p203_p4 = scmp.lt.s32.totalorder %s27_s13, %s27_s13 }
   0xa   :  { %p199_p3 = scmp.ne.s32.totalorder %s27_s13, %s198_s21  ;;  %p204_p5 = scmp.lt.s32.totalorder %s198_s21, %s198_s21 }
   0xc   :  { %p205_p6 = por %p204_p5, %p203_p4 }
   0xe   :  { %p206_p7 = pnand %p205_p6, %p199_p3 }
  0x10   :  { %209 = shalt.err (!%p206_p7)
}
  0x11   :  { %s283_s22 = smov 128   ;;  %s284_s23 = smov 8  }
  0x12   :  { %32 = dma.hbm_to_vmem [thread:$0]  %s360_s1, 512, %s27_s13, [#allocation6], %s283_s22, %s283_s22, %s284_s23  }
  0x13   :  { %s285_s26 = smov [#allocation2]   ;;  %s286_s28 = smov [#allocation7]  }
  0x14   :  { %s17_s27 = sshll.u32 %s285_s26, 4  ;;  %s39_s29 = sshll.u32 %s286_s28, 4  ;;  %s18_s27 = int_to_ptr.vmem [resolvable:$true] %s17_s27  ;;  %s40_s29 = int_to_ptr.vmem [resolvable:$true] %s39_s29 }
  0x15   :  { %s210_s5 = scalar_lea.hbm %s359_s0, 128 }
  0x16   :  { %p211_p8 = scmp.ne.s32.totalorder %s359_s0, %s210_s5  ;;  %p214_p9 = scmp.lt.u32.totalorder %s210_s5, %s359_s0 }
  0x18   :  { %p216_p10 = pnand %p214_p9, %p211_p8 }
  0x1a   :  { %219 = shalt.err (!%p216_p10)
}
  0x1b   :  { %s220_s1 = scalar_lea.vmem %s18_s27, 128  ;;  %p225_p12 = scmp.lt.s32.totalorder %s18_s27, %s18_s27 }
  0x1c   :  { %p221_p11 = scmp.ne.s32.totalorder %s18_s27, %s220_s1  ;;  %p226_p13 = scmp.lt.s32.totalorder %s220_s1, %s220_s1 }
  0x1e   :  { %p227_p0 = por %p226_p13, %p225_p12 }
  0x20   :  { %p228_p1 = pnand %p227_p0, %p221_p11 }
  0x22   :  { %231 = shalt.err (!%p228_p1)
}
  0x23   :  { %20 = dma.hbm_to_vmem [thread:$0]  %s359_s0, 128, %s18_s27, [#allocation3]  }
  0x24   :  { %s232_s14 = scalar_lea.hbm %s361_s2, 16 }
  0x25   :  { %p233_p2 = scmp.ne.s32.totalorder %s361_s2, %s232_s14  ;;  %p236_p3 = scmp.lt.u32.totalorder %s232_s14, %s361_s2 }
  0x27   :  { %p238_p4 = pnand %p236_p3, %p233_p2 }
  0x29   :  { %241 = shalt.err (!%p238_p4)
}
  0x2a   :  { %s242_s19 = scalar_lea.vmem %s40_s29, 16  ;;  %s246_s20 = scalar_lea.vmem %s40_s29, 32 }
  0x2b   :  { %p243_p5 = scmp.ne.s32.totalorder %s40_s29, %s242_s19  ;;  %p247_p6 = scmp.lt.s32.totalorder %s40_s29, %s40_s29 }
  0x2c   :  { %p248_p7 = scmp.lt.s32.totalorder %s246_s20, %s242_s19 }
  0x2e   :  { %p249_p8 = por %p248_p7, %p247_p6 }
  0x30   :  { %p250_p9 = pnand %p249_p8, %p243_p5 }
  0x32   :  { %253 = shalt.err (!%p250_p9)
}
  0x33   :  { %42 = dma.hbm_to_vmem [thread:$0]  %s361_s2, 16, %s40_s29, [#allocation6]  }
  0x34   :  { %276 = dma.done.wait [#allocation3], 128  }
  0x35   :  { %277 = vsyncadd [#allocation3], 4294967168 }
  0x36   :  { %278 = dma.done.wait [#allocation6], 528  }
  0x37   :  { %279 = vsyncadd [#allocation6], 4294966768  ;;  %v287_v0 = vmov 0.0|0.0   ;;  %vm288_vm0 = vmmov 0   ;;  %v289_v1 = vmov 0.0   ;;  %v53_v2 = vld [vmem:[#allocation5] sm:$0xff] }
  0x38   :  { %173 = vmatprep.subr.bf16.mxu0 %v287_v0  ;;  %170 = vmatprep.mubr.msk.f32.mxu0 %vm288_vm0, %v289_v1  ;;  %v54_v3 = vld [vmem:[#allocation5 + $0x8] sm:$0xff]  ;;  %v55_v4 = vld [vmem:[#allocation5 + $0x10] sm:$0xff]  ;;  %v56_v6 = vld [vmem:[#allocation5 + $0x18] sm:$0xff]  ;;  %vm64_vm1 = vcmask 261120   ;;  %s290_s2 = smov [#allocation8]  }
  0x39   :  { %v174_v5 = vpack.c.bf16 %v54_v3, %v53_v2  ;;  %v177_v7 = vpack.c.bf16 %v56_v6, %v55_v4  ;;  %v52_v8 = vld [vmem:[#allocation2] sm:$0xff]  ;;  %v155_v9 = vld [vmem:[#allocation7] ss:$0 sm:$0xff]  ;;  %s145_s22 = sshll.u32 %s290_s2, 4  ;;  %s146_s22 = int_to_ptr.vmem [resolvable:$true] %s145_s22 }
  0x3a   :  { %s254_s23 = scalar_lea.vmem %s146_s22, 128  ;;  %p259_p11 = scmp.lt.s32.totalorder %s146_s22, %s146_s22 }
  0x3b   :  { %175 = vmatpush3.bf16.msra.mxu0 %v174_v5  ;;  %p255_p10 = scmp.ne.s32.totalorder %s146_s22, %s254_s23  ;;  %p260_p12 = scmp.lt.s32.totalorder %s254_s23, %s254_s23 }
  0x3c   :  { %176 = vmatprep.subr.bf16.mxu0 %v287_v0 }
  0x3d   :  { %p261_p13 = por %p260_p12, %p259_p11 }
  0x3f   :  { %178 = vmatpush3.bf16.msra.mxu0 %v177_v7  ;;  %p262_p0 = pnand %p261_p13, %p255_p10 }
  0x42   :  { %171 = vmatmul.mubr.msk.f32.vlgmr.msra.gmra.mrb[0].mxu0 %vm64_vm1, %v52_v8 }
 0x115   :  { %v134_v10 = vpop.f32.mrb[0].mxu0 }
 0x116   :  { %v135_v11 = vadd.f32 %v155_v9, %v134_v10  ;;  %v172_v12 = vpop.f32.mrb[1].mxu0 }
 0x118   :  { %138 = vst [vmem:[#allocation8] sm:$0xff] %v135_v11 }
 0x119   :  { %265 = shalt.err (!%p262_p0)
}
 0x11a   :  { %s266_s26 = scalar_lea.hbm %s362_s3, 128 }
 0x11b   :  { %p267_p1 = scmp.ne.s32.totalorder %s362_s3, %s266_s26  ;;  %p270_p2 = scmp.lt.u32.totalorder %s266_s26, %s362_s3 }
 0x11d   :  { %p272_p3 = pnand %p270_p2, %p267_p1 }
 0x11f   :  { %275 = shalt.err (!%p272_p3)
}
 0x120   :  { %148 = dma.vmem_to_hbm [thread:$0]  %s146_s22, 128, %s362_s3, [#allocation4]  }
 0x121   :  { %280 = dma.done.wait [#allocation4], 128  }
 0x122   :  { %281 = vsyncadd [#allocation4], 4294967168 }
 0x123   :  { %152 = vsyncpa [#allocation3], 1 }
 0x124   :  { %153 = vsyncpa [#allocation6], 1 }
 0x125   :  { %154 = vsyncpa [#allocation4], 1 }

</bundles_post_ra>
